<compile_context>
chip_gen: v6e
topology: v6e:2x2x1
jax: 0.10.0
libtpu: 0.0.40
codegen_flags: <defaults>
</compile_context>

<pallas_src>
import jax
import jax.numpy as jnp
from jax.experimental import pallas as pl
from jax.experimental.pallas import tpu as pltpu


_VMEM_BUDGET_BYTES = 26 * 1024 * 1024   # target live bytes (x+out dbl-buf + padded pos dbl-buf)
_VMEM_LIMIT_BYTES = 48 * 1024 * 1024    # scoped VMEM limit (< v7x 64 MiB physical)
_MIN_SPLIT_BYTES = 512 * 1024           # only split a degenerate (1,1) grid above this size


def _add_pos_kernel(x_ref, pos_ref, o_ref):
    # x_ref/o_ref: (bb, bl) or (bb, bs, D); pos_ref: (1, bl) or (bs, D).
    # The add broadcasts pos over the leading (batch) axis in both layouts.
    o_ref[...] = (x_ref[...].astype(jnp.float32)
                  + pos_ref[...].astype(jnp.float32)).astype(o_ref.dtype)


def _round_down(v, m):
    return max(m, (v // m) * m)


def _round_up(v, m):
    return -(-v // m) * m


def learnable_positional_encoding(x, pos_table, *, dropout_p=0.1, training=False,
                                  alias_out_to_x=False):
    """Forward pass of LearnablePositionalEncoding (eval mode).

    x:         (n_batch, n_token, d_embed)
    pos_table: (max_seq_len, d_embed)  -- nn.Embedding weight
    """
    if training and dropout_p > 0.0:
        # TODO(synk): training-mode dropout (p=dropout_p) not implemented in the kernel.
        raise NotImplementedError("training-mode dropout is not implemented")

    B, S, D = x.shape
    max_seq_len, d_embed = pos_table.shape
    if D != d_embed:
        raise ValueError(f"d_embed mismatch: x has {D}, table has {d_embed}")
    if S > max_seq_len:
        raise ValueError(f"n_token={S} exceeds max_seq_len={max_seq_len}")

    # Pre-cast the (small) table once: halves pos DMA bytes + VMEM buffers when
    # x is lower precision.  Output dtype is x.dtype in all cases.
    if pos_table.dtype != x.dtype:
        pos_table = pos_table.astype(x.dtype)

    itemsize = jnp.dtype(x.dtype).itemsize
    # Dtype-aware batch tile: pack sublanes densely (8 f32 / 16 bf16 / 32 int8).
    bb_full = max(8, 32 // itemsize)
    bb = B if B <= bb_full else bb_full
    nb = pl.cdiv(B, bb)

    L = S * D
    cost = pl.CostEstimate(
        flops=B * L,
        transcendentals=0,
        bytes_accessed=(2 * B * L + S * D) * itemsize,
    )
    cparams = pltpu.CompilerParams(
        dimension_semantics=("parallel", "parallel"),
        vmem_limit_bytes=_VMEM_LIMIT_BYTES,
    )

    if L % 128 == 0:
        # ---- Lane-dense path: flatten (token, embed) into the lane axis. ----
        x2 = x.reshape(B, L)
        pos2 = pos_table.reshape(1, max_seq_len * d_embed)  # free row-major reshape

        # Bytes per lane element of live VMEM:
        #   x + out double-buffered: 4 * bb * itemsize
        #   pos (1, bl) block is padded to 8 sublanes and double-buffered: 16 * itemsize
        per_lane = 4 * bb * itemsize + 16 * itemsize
        cap = _round_down(_VMEM_BUDGET_BYTES // per_lane, 128)
        bl = L if L <= cap else cap
        nl = pl.cdiv(L, bl)

        # Give v7x megacore >= 2 steps on non-trivial degenerate grids.
        if nl == 1 and nb == 1 and L >= 256 and B * L * itemsize >= _MIN_SPLIT_BYTES:
            bl = _round_up(L // 2, 128)
            nl = pl.cdiv(L, bl)

        grid = (nl, nb)  # lane tiles outermost -> pos tile reused across batch tiles
        in_specs = [
            pl.BlockSpec((bb, bl), lambda l, b: (b, l)),   # x tile
            pl.BlockSpec((1, bl), lambda l, b: (0, l)),    # shared pos tile
        ]
        out_spec = pl.BlockSpec((bb, bl), lambda l, b: (b, l))
        out_shape = jax.ShapeDtypeStruct((B, L), x.dtype)
        operands = (x2, pos2)
    else:
        # ---- Fallback (S*D not a multiple of 128): tile tokens in 3-D. ----
        # The tiny (S, D) slice is materialized once in the wrapper so both the
        # x and pos block shapes can legally use bs == S / bs % 8 == 0.
        pos_s = pos_table[:S]
        d_pad = _round_up(D, 128)
        # Bytes per token of live VMEM (x + out double-buffered over bb rows,
        # pos double-buffered; lane dim padded to a multiple of 128).
        per_token = 4 * bb * d_pad * itemsize + 2 * d_pad * itemsize
        bs_cap = max(8, _round_down(_VMEM_BUDGET_BYTES // per_token, 8))
        bs = S if S <= bs_cap else bs_cap
        grid = (pl.cdiv(S, bs), nb)
        in_specs = [
            pl.BlockSpec((bb, bs, D), lambda s, b: (b, s, 0)),  # x tile
            pl.BlockSpec((bs, D), lambda s, b: (s, 0)),         # shared pos tile
        ]
        out_spec = pl.BlockSpec((bb, bs, D), lambda s, b: (b, s, 0))
        out_shape = jax.ShapeDtypeStruct((B, S, D), x.dtype)
        operands = (x, pos_s)

    out = pl.pallas_call(
        _add_pos_kernel,
        out_shape=out_shape,
        grid_spec=pltpu.PrefetchScalarGridSpec(
            num_scalar_prefetch=0,
            grid=grid,
            in_specs=in_specs,
            out_specs=out_spec,
        ),
        compiler_params=cparams,
        cost_estimate=cost,
        # Only useful when x is donated at the jit boundary; otherwise XLA
        # inserts a defensive copy, so it is off by default.
        input_output_aliases=({0: 0} if alias_out_to_x else {}),
    )(*operands)

    # Eval-mode dropout is the identity.
    return out.reshape(B, S, D)


if __name__ == "__main__":
    key = jax.random.PRNGKey(0)
    k_x, k_emb, k_x2, k_emb2 = jax.random.split(key, 4)

    # --- main case (lane-dense path): batch=2, seq=8, d_embed=32 ---
    batch, seq, d_embed = 2, 8, 32
    max_seq_len = 512

    pos_table = jax.random.normal(k_emb, (max_seq_len, d_embed), dtype=jnp.float32)
    x = jax.random.normal(k_x, (batch, seq, d_embed), dtype=jnp.float32)

    out = learnable_positional_encoding(x, pos_table)
    out = jax.block_until_ready(out)

    ref = x + pos_table[:seq, :][None, :, :]
    assert out.shape == (batch, seq, d_embed)
    assert jnp.allclose(out, ref, atol=1e-6, rtol=1e-6)

    # --- fallback case (S*D not a multiple of 128): seq=10, d_embed=24 ---
    seq2, d_embed2 = 10, 24
    pos_table2 = jax.random.normal(k_emb2, (max_seq_len, d_embed2), dtype=jnp.float32)
    x2 = jax.random.normal(k_x2, (batch, seq2, d_embed2), dtype=jnp.float32)

    out2 = learnable_positional_encoding(x2, pos_table2)
    out2 = jax.block_until_ready(out2)

    ref2 = x2 + pos_table2[:seq2, :][None, :, :]
    assert out2.shape == (batch, seq2, d_embed2)
    assert jnp.allclose(out2, ref2, atol=1e-6, rtol=1e-6)

    print("KERNEL_OK")
</pallas_src>

<mosaic_0001>
module attributes {stable_mosaic.version = 11 : i64} {
  func.func @_add_pos_kernel(%arg0: i32, %arg1: i32, %arg2: memref<2x256xf32, #tpu.memory_space<vmem>>, %arg3: memref<1x256xf32, #tpu.memory_space<vmem>>, %arg4: memref<2x256xf32, #tpu.memory_space<vmem>>) attributes {dimension_semantics = [#tpu.dimension_semantics<parallel>, #tpu.dimension_semantics<parallel>], iteration_bounds = array<i64: 1, 1>, scalar_prefetch = 0 : i64, scratch_operands = 0 : i64, tpu.core_type = #tpu.core_type<tc>, window_params = [{transform_indices = @transform_0, window_bounds = array<i64: 2, 256>}, {transform_indices = @transform_1, window_bounds = array<i64: 1, 256>}, {transform_indices = @transform_2, window_bounds = array<i64: 2, 256>}]} {
    %c0 = arith.constant 0 : index
    %c0_0 = arith.constant 0 : index
    %0 = vector.load %arg2[%c0, %c0_0] : memref<2x256xf32, #tpu.memory_space<vmem>>, vector<2x256xf32>
    %c0_1 = arith.constant 0 : index
    %c0_2 = arith.constant 0 : index
    %1 = vector.load %arg3[%c0_1, %c0_2] : memref<1x256xf32, #tpu.memory_space<vmem>>, vector<1x256xf32>
    %2 = vector.broadcast %1 : vector<1x256xf32> to vector<2x256xf32>
    %3 = arith.addf %0, %2 : vector<2x256xf32>
    %c0_3 = arith.constant 0 : index
    %c0_4 = arith.constant 0 : index
    %4 = vector.load %arg4[%c0_3, %c0_4] : memref<2x256xf32, #tpu.memory_space<vmem>>, vector<2x256xf32>
    tpu.vector_store %arg4[%c0_3, %c0_4], %3 {strides = array<i32>} : memref<2x256xf32, #tpu.memory_space<vmem>>, vector<2x256xf32>,
    return
  }
  func.func @transform_0(%arg0: i32, %arg1: i32) -> (i32, i32) {
    %c0_i32 = arith.constant 0 : i32
    return %arg1, %arg0 : i32, i32
  }
  func.func @transform_1(%arg0: i32, %arg1: i32) -> (i32, i32) {
    %c0_i32 = arith.constant 0 : i32
    %c0_i32_0 = arith.constant 0 : i32
    return %c0_i32, %arg0 : i32, i32
  }
  func.func @transform_2(%arg0: i32, %arg1: i32) -> (i32, i32) {
    %c0_i32 = arith.constant 0 : i32
    return %arg1, %arg0 : i32, i32
  }
}

</mosaic_0001>

<bundles_post_ra>
// kernel: tpu_custom_call.1
= control target key start
LH: loop header
LB: loop body
LE: loop exit
PB: predicated region body
PF: predicated region fallthrough
CT: control target
= control target key end

     0   :  { %7 = vsyncpa [#allocation3], 0  ;;  %s172_s0 = inlined_call_operand.hbm [shape: f32[2,256], index: 0, kind: input, shape index: {}]   ;;  %s173_s1 = inlined_call_operand.hbm [shape: f32[1,16384], index: 1, kind: input, shape index: {}]   ;;  %s174_s2 = inlined_call_operand.hbm [shape: f32[2,256], index: 2, kind: output, shape index: {}]  }
   0x1   :  { %8 = vsyncpa [#allocation6], 0 }
   0x2   :  { %9 = vsyncpa [#allocation4], 0  ;;  %s144_s9 = smov [#allocation2]   ;;  %s145_s11 = smov [#allocation5]  }
   0x3   :  { %s16_s10 = sshll.u32 %s144_s9, 4  ;;  %s26_s12 = sshll.u32 %s145_s11, 4  ;;  %s17_s10 = int_to_ptr.vmem [resolvable:$true] %s16_s10  ;;  %s27_s12 = int_to_ptr.vmem [resolvable:$true] %s26_s12 }
   0x4   :  { %s86_s13 = scalar_lea.vmem %s17_s10, 64  ;;  %p91_p1 = scmp.lt.s32.totalorder %s17_s10, %s17_s10 }
   0x5   :  { %p87_p0 = scmp.ne.s32.totalorder %s17_s10, %s86_s13  ;;  %p92_p2 = scmp.lt.s32.totalorder %s86_s13, %s86_s13 }
   0x7   :  { %p93_p3 = por %p92_p2, %p91_p1 }
   0x9   :  { %p94_p4 = pnand %p93_p3, %p87_p0 }
   0xb   :  { %97 = shalt.err (!%p94_p4)
}
   0xc   :  { %19 = dma.hbm_to_vmem [thread:$0]  %s172_s0, 64, %s17_s10, [#allocation3]  }
   0xd   :  { %s106_s16 = scalar_lea.vmem %s27_s12, 32  ;;  %p111_p6 = scmp.lt.s32.totalorder %s27_s12, %s27_s12 }
   0xe   :  { %p107_p5 = scmp.ne.s32.totalorder %s27_s12, %s106_s16  ;;  %p112_p7 = scmp.lt.s32.totalorder %s106_s16, %s106_s16 }
  0x10   :  { %p113_p8 = por %p112_p7, %p111_p6 }
  0x12   :  { %p114_p9 = pnand %p113_p8, %p107_p5 }
  0x14   :  { %117 = shalt.err (!%p114_p9)
}
  0x15   :  { %29 = dma.hbm_to_vmem [thread:$0]  %s173_s1, 32, %s27_s12, [#allocation6]  }
  0x16   :  { %138 = dma.done.wait [#allocation3], 64  }
  0x17   :  { %139 = vsyncadd [#allocation3], 4294967232 }
  0x18   :  { %140 = dma.done.wait [#allocation6], 32  }
  0x19   :  { %141 = vsyncadd [#allocation6], 4294967264  ;;  %v39_v0 = vlaneseq  ;;  %v146_v1 = vmov 1983009808   ;;  %v37_v7 = vld [vmem:[#allocation5] sm:$0x3] }
  0x1a   :  { %v49_v2 = vunpack.c.l.s4 %v146_v1  ;;  %v36_v12 = vld [vmem:[#allocation2] sm:$0xf]  ;;  %s147_s0 = smov [#allocation7]  }
  0x1b   :  { %v40_v3 = vshrl.u32 %v39_v0, 7  ;;  %s64_s19 = sshll.u32 %s147_s0, 4  ;;  %s65_s19 = int_to_ptr.vmem [resolvable:$true] %s64_s19 }
  0x1c   :  { %v50_v6 = vunpack.c.0.s8 %v49_v2  ;;  %s118_s1 = scalar_lea.vmem %s65_s19, 64  ;;  %p123_p11 = scmp.lt.s32.totalorder %s65_s19, %s65_s19 }
  0x1d   :  { %v41_v4 = vsub.s32 0, %v40_v3  ;;  %v45_v5 = vsub.s32 1, %v40_v3  ;;  %p119_p10 = scmp.ne.s32.totalorder %s65_s19, %s118_s1  ;;  %p124_p12 = scmp.lt.s32.totalorder %s118_s1, %s118_s1 }
  0x1e   :  { %v53_v10 = vsub.s32 %v50_v6, %v40_v3 }
  0x1f   :  { %v42_v8 = vrot.slane %v37_v7, %v41_v4  ;;  %v46_v9 = vrot.slane %v37_v7, %v45_v5  ;;  %p125_p13 = por %p124_p12, %p123_p11 }
  0x21   :  { %v47_v11 = vcombine.low %v42_v8, %v46_v9  ;;  %p126_p0 = pnand %p125_p13, %p119_p10 }
  0x23   :  { %v54_v13 = vrot.slane %v47_v11, %v53_v10 }
  0x25   :  { %v56_v14 = vadd.f32 %v54_v13, %v36_v12 }
  0x27   :  { %57 = vst [vmem:[#allocation7] sm:$0xf] %v56_v14 }
  0x28   :  { %129 = shalt.err (!%p126_p0)
}
  0x29   :  { %67 = dma.vmem_to_hbm [thread:$0]  %s65_s19, 64, %s174_s2, [#allocation4]  }
  0x2a   :  { %142 = dma.done.wait [#allocation4], 64  }
  0x2b   :  { %143 = vsyncadd [#allocation4], 4294967232 }
  0x2c   :  { %71 = vsyncpa [#allocation3], 1 }
  0x2d   :  { %72 = vsyncpa [#allocation6], 1 }
  0x2e   :  { %73 = vsyncpa [#allocation4], 1 }

</bundles_post_ra>
